<compile_context>
chip_gen: v7x
topology: tpu7x:2x2x1
jax: 0.10.0
libtpu: 0.0.40
codegen_flags: <defaults>
</compile_context>

<pallas_src>
import functools
import math

import jax
import jax.numpy as jnp
from jax.experimental import pallas as pl
from jax.experimental.pallas import tpu as pltpu


# ------------------------------ Pallas kernel ------------------------------

def _embedding_gather_kernel(ids_ref, lut_hbm, o_ref, buf, sem, *, scale, nbuf):
    """DMA row-gather + scale for one block of token rows.

    ids_ref : (Mp,)   int32 token ids, full array in SMEM (scalar prefetch)
    lut_hbm : (V, D)  embedding table, left in HBM (memory_space=pl.ANY)
    o_ref   : (tm, D) output block in VMEM
    buf     : (nbuf, D) VMEM ring buffer of in-flight row copies
    sem     : (nbuf,) DMA semaphores (one per ring slot)
    """
    tm, _ = o_ref.shape
    base = pl.program_id(0) * tm

    def start_row(r, slot):
        tok = ids_ref[base + r]                      # SMEM scalar read
        pltpu.make_async_copy(
            lut_hbm.at[pl.ds(tok, 1), :],            # one (1, D) row from HBM
            buf.at[pl.ds(slot, 1), :],
            sem.at[slot],
        ).start()

    # Prime the pipeline: up to `nbuf` row DMAs in flight.
    for s in range(min(nbuf, tm)):
        start_row(s, s)

    @pl.loop(0, tm)
    def _(r):
        slot = r % nbuf
        # Wait on this slot's DMA (src indices are irrelevant for the wait).
        pltpu.make_async_copy(
            lut_hbm.at[pl.ds(0, 1), :],
            buf.at[pl.ds(slot, 1), :],
            sem.at[slot],
        ).wait()
        row = buf[pl.ds(slot, 1), :].astype(jnp.float32)      # (1, D)
        o_ref[pl.ds(r, 1), :] = (row * scale).astype(o_ref.dtype)

        # Refill the slot we just consumed (keeps `nbuf` copies in flight).
        @pl.when(r + nbuf < tm)
        def _():
            start_row(r + nbuf, slot)


# ------------------------------- Wrapper -----------------------------------

def embeddings_forward(lut, tokens, *, block_rows=128, dma_ring=8):
    """PyTorch Embeddings.forward: lut[tokens] * sqrt(d_model).

    lut:    (vocab, d_model) embedding table (nn.Embedding weight)
    tokens: integer array of any shape (e.g. (batch, seq))
    returns tokens.shape + (d_model,)
    """
    V, D = lut.shape
    scale = math.sqrt(D)

    token_shape = tokens.shape
    M = 1
    for s in token_shape:
        M *= int(s)

    if M == 0:   # empty input: nothing to gather
        return jnp.zeros((*token_shape, D), lut.dtype)

    # Clamp ids so a bad/negative token can never drive an OOB HBM DMA
    # (PyTorch would raise; we choose clamping for kernel safety).
    ids = jnp.clip(tokens.reshape(M).astype(jnp.int32), 0, V - 1)

    # Dtype-aware sublane rounding of the row block (8 f32 / 16 bf16 / 32 int8).
    sublane = max(8, 32 // jnp.dtype(lut.dtype).itemsize)
    tm = min(block_rows, M)
    tm = ((tm + sublane - 1) // sublane) * sublane
    Mp = ((M + tm - 1) // tm) * tm
    if Mp != M:
        ids = jnp.pad(ids, (0, Mp - M))              # padded rows gather row 0

    grid = (Mp // tm,)
    nbuf = max(2, min(dma_ring, tm))                 # DMA copies in flight

    out = pl.pallas_call(
        functools.partial(_embedding_gather_kernel, scale=scale, nbuf=nbuf),
        out_shape=jax.ShapeDtypeStruct((Mp, D), lut.dtype),
        grid_spec=pltpu.PrefetchScalarGridSpec(
            num_scalar_prefetch=1,                   # ids -> SMEM
            grid=grid,
            in_specs=[pl.BlockSpec(memory_space=pl.ANY)],   # table stays in HBM
            out_specs=pl.BlockSpec((tm, D), lambda i, ids_ref: (i, 0)),
            scratch_shapes=[
                pltpu.VMEM((nbuf, D), lut.dtype),
                pltpu.SemaphoreType.DMA((nbuf,)),
            ],
        ),
        compiler_params=pltpu.CompilerParams(
            dimension_semantics=("parallel",)),      # shards across v7x 2xTC
    )(ids, lut)

    return out[:M].reshape(*token_shape, D)


# --------------------------------- main -------------------------------------

if __name__ == "__main__":
    d_model, vocab = 32, 16
    B, T = 2, 8

    root = jax.random.PRNGKey(0)
    k_lut, k_tok, k_tok2 = jax.random.split(root, 3)
    lut = jax.random.normal(k_lut, (vocab, d_model), jnp.float32)  # nn.Embedding weight
    tokens = jax.random.randint(k_tok, (B, T), 0, vocab)

    # Small row block -> grid=(2,): exercises the multi-step pipeline.
    out = embeddings_forward(lut, tokens, block_rows=8)
    out = jax.block_until_ready(out)

    ref = jnp.take(lut, tokens, axis=0) * math.sqrt(d_model)
    assert out.shape == (B, T, d_model), out.shape
    assert bool(jnp.all(jnp.isfinite(out)))
    assert bool(jnp.allclose(out, ref, atol=1e-6, rtol=1e-6))

    # Non-divisible row count (M=15 -> padded to 16) exercises the padding path.
    tokens2 = jax.random.randint(k_tok2, (3, 5), 0, vocab)
    out2 = jax.block_until_ready(embeddings_forward(lut, tokens2))
    ref2 = jnp.take(lut, tokens2, axis=0) * math.sqrt(d_model)
    assert out2.shape == (3, 5, d_model)
    assert bool(jnp.allclose(out2, ref2, atol=1e-6, rtol=1e-6))

    print("KERNEL_OK")
</pallas_src>

<mosaic_0001>
module attributes {stable_mosaic.version = 11 : i64} {
  func.func @_embedding_gather_kernel(%arg0: i32, %arg1: memref<16xi32, #tpu.memory_space<smem>>, %arg2: memref<16x32xf32, #tpu.memory_space<any>>, %arg3: memref<8x32xf32, #tpu.memory_space<vmem>>, %arg4: memref<8x32xf32, #tpu.memory_space<vmem>>, %arg5: memref<8x!tpu.dma_semaphore, #tpu.memory_space<semaphore_mem>>) attributes {dimension_semantics = [#tpu.dimension_semantics<parallel>], iteration_bounds = array<i64: 2>, scalar_prefetch = 1 : i64, scratch_operands = 2 : i64, tpu.core_type = #tpu.core_type<tc>, window_params = [{}, {transform_indices = @transform_1, window_bounds = array<i64: 8, 32>}]} {
    %c8_i32 = arith.constant 8 : i32
    %0 = arith.muli %arg0, %c8_i32 : i32
    %c0_i32 = arith.constant 0 : i32
    %1 = arith.addi %0, %c0_i32 : i32
    %2 = arith.index_cast %1 : i32 to index
    %3 = memref.load %arg1[%2] : memref<16xi32, #tpu.memory_space<smem>>
    %c0_i32_0 = arith.constant 0 : i32
    %c0_i32_1 = arith.constant 0 : i32
    %4 = tpu.memref_slice %arg2[%3, %c0_i32_1] : memref<16x32xf32, #tpu.memory_space<any>> -> memref<1x32xf32, #tpu.memory_space<any>>
    %c0_i32_2 = arith.constant 0 : i32
    %c0_i32_3 = arith.constant 0 : i32
    %5 = tpu.memref_slice %arg4[%c0_i32_2, %c0_i32_3] : memref<8x32xf32, #tpu.memory_space<vmem>> -> memref<1x32xf32, #tpu.memory_space<vmem>>
    %6 = tpu.memref_slice %arg5[%c0_i32_0] : memref<8x!tpu.dma_semaphore, #tpu.memory_space<semaphore_mem>> -> memref<1x!tpu.dma_semaphore, #tpu.memory_space<semaphore_mem>>
    %7 = tpu.memref_squeeze %6 : memref<1x!tpu.dma_semaphore, #tpu.memory_space<semaphore_mem>> -> memref<!tpu.dma_semaphore, #tpu.memory_space<semaphore_mem>>
    tpu.enqueue_dma source(%4 : memref<1x32xf32, #tpu.memory_space<any>>) target(%5 : memref<1x32xf32, #tpu.memory_space<vmem>>) target_semaphore(%7 : memref<!tpu.dma_semaphore, #tpu.memory_space<semaphore_mem>>)
    %c1_i32 = arith.constant 1 : i32
    %8 = arith.addi %0, %c1_i32 : i32
    %9 = arith.index_cast %8 : i32 to index
    %10 = memref.load %arg1[%9] : memref<16xi32, #tpu.memory_space<smem>>
    %c1_i32_4 = arith.constant 1 : i32
    %c0_i32_5 = arith.constant 0 : i32
    %11 = tpu.memref_slice %arg2[%10, %c0_i32_5] : memref<16x32xf32, #tpu.memory_space<any>> -> memref<1x32xf32, #tpu.memory_space<any>>
    %c1_i32_6 = arith.constant 1 : i32
    %c0_i32_7 = arith.constant 0 : i32
    %12 = tpu.memref_slice %arg4[%c1_i32_6, %c0_i32_7] : memref<8x32xf32, #tpu.memory_space<vmem>> -> memref<1x32xf32, #tpu.memory_space<vmem>>
    %13 = tpu.memref_slice %arg5[%c1_i32_4] : memref<8x!tpu.dma_semaphore, #tpu.memory_space<semaphore_mem>> -> memref<1x!tpu.dma_semaphore, #tpu.memory_space<semaphore_mem>>
    %14 = tpu.memref_squeeze %13 : memref<1x!tpu.dma_semaphore, #tpu.memory_space<semaphore_mem>> -> memref<!tpu.dma_semaphore, #tpu.memory_space<semaphore_mem>>
    tpu.enqueue_dma source(%11 : memref<1x32xf32, #tpu.memory_space<any>>) target(%12 : memref<1x32xf32, #tpu.memory_space<vmem>>) target_semaphore(%14 : memref<!tpu.dma_semaphore, #tpu.memory_space<semaphore_mem>>)
    %c2_i32 = arith.constant 2 : i32
    %15 = arith.addi %0, %c2_i32 : i32
    %16 = arith.index_cast %15 : i32 to index
    %17 = memref.load %arg1[%16] : memref<16xi32, #tpu.memory_space<smem>>
    %c2_i32_8 = arith.constant 2 : i32
    %c0_i32_9 = arith.constant 0 : i32
    %18 = tpu.memref_slice %arg2[%17, %c0_i32_9] : memref<16x32xf32, #tpu.memory_space<any>> -> memref<1x32xf32, #tpu.memory_space<any>>
    %c2_i32_10 = arith.constant 2 : i32
    %c0_i32_11 = arith.constant 0 : i32
    %19 = tpu.memref_slice %arg4[%c2_i32_10, %c0_i32_11] : memref<8x32xf32, #tpu.memory_space<vmem>> -> memref<1x32xf32, #tpu.memory_space<vmem>>
    %20 = tpu.memref_slice %arg5[%c2_i32_8] : memref<8x!tpu.dma_semaphore, #tpu.memory_space<semaphore_mem>> -> memref<1x!tpu.dma_semaphore, #tpu.memory_space<semaphore_mem>>
    %21 = tpu.memref_squeeze %20 : memref<1x!tpu.dma_semaphore, #tpu.memory_space<semaphore_mem>> -> memref<!tpu.dma_semaphore, #tpu.memory_space<semaphore_mem>>
    tpu.enqueue_dma source(%18 : memref<1x32xf32, #tpu.memory_space<any>>) target(%19 : memref<1x32xf32, #tpu.memory_space<vmem>>) target_semaphore(%21 : memref<!tpu.dma_semaphore, #tpu.memory_space<semaphore_mem>>)
    %c3_i32 = arith.constant 3 : i32
    %22 = arith.addi %0, %c3_i32 : i32
    %23 = arith.index_cast %22 : i32 to index
    %24 = memref.load %arg1[%23] : memref<16xi32, #tpu.memory_space<smem>>
    %c3_i32_12 = arith.constant 3 : i32
    %c0_i32_13 = arith.constant 0 : i32
    %25 = tpu.memref_slice %arg2[%24, %c0_i32_13] : memref<16x32xf32, #tpu.memory_space<any>> -> memref<1x32xf32, #tpu.memory_space<any>>
    %c3_i32_14 = arith.constant 3 : i32
    %c0_i32_15 = arith.constant 0 : i32
    %26 = tpu.memref_slice %arg4[%c3_i32_14, %c0_i32_15] : memref<8x32xf32, #tpu.memory_space<vmem>> -> memref<1x32xf32, #tpu.memory_space<vmem>>
    %27 = tpu.memref_slice %arg5[%c3_i32_12] : memref<8x!tpu.dma_semaphore, #tpu.memory_space<semaphore_mem>> -> memref<1x!tpu.dma_semaphore, #tpu.memory_space<semaphore_mem>>
    %28 = tpu.memref_squeeze %27 : memref<1x!tpu.dma_semaphore, #tpu.memory_space<semaphore_mem>> -> memref<!tpu.dma_semaphore, #tpu.memory_space<semaphore_mem>>
    tpu.enqueue_dma source(%25 : memref<1x32xf32, #tpu.memory_space<any>>) target(%26 : memref<1x32xf32, #tpu.memory_space<vmem>>) target_semaphore(%28 : memref<!tpu.dma_semaphore, #tpu.memory_space<semaphore_mem>>)
    %c4_i32 = arith.constant 4 : i32
    %29 = arith.addi %0, %c4_i32 : i32
    %30 = arith.index_cast %29 : i32 to index
    %31 = memref.load %arg1[%30] : memref<16xi32, #tpu.memory_space<smem>>
    %c4_i32_16 = arith.constant 4 : i32
    %c0_i32_17 = arith.constant 0 : i32
    %32 = tpu.memref_slice %arg2[%31, %c0_i32_17] : memref<16x32xf32, #tpu.memory_space<any>> -> memref<1x32xf32, #tpu.memory_space<any>>
    %c4_i32_18 = arith.constant 4 : i32
    %c0_i32_19 = arith.constant 0 : i32
    %33 = tpu.memref_slice %arg4[%c4_i32_18, %c0_i32_19] : memref<8x32xf32, #tpu.memory_space<vmem>> -> memref<1x32xf32, #tpu.memory_space<vmem>>
    %34 = tpu.memref_slice %arg5[%c4_i32_16] : memref<8x!tpu.dma_semaphore, #tpu.memory_space<semaphore_mem>> -> memref<1x!tpu.dma_semaphore, #tpu.memory_space<semaphore_mem>>
    %35 = tpu.memref_squeeze %34 : memref<1x!tpu.dma_semaphore, #tpu.memory_space<semaphore_mem>> -> memref<!tpu.dma_semaphore, #tpu.memory_space<semaphore_mem>>
    tpu.enqueue_dma source(%32 : memref<1x32xf32, #tpu.memory_space<any>>) target(%33 : memref<1x32xf32, #tpu.memory_space<vmem>>) target_semaphore(%35 : memref<!tpu.dma_semaphore, #tpu.memory_space<semaphore_mem>>)
    %c5_i32 = arith.constant 5 : i32
    %36 = arith.addi %0, %c5_i32 : i32
    %37 = arith.index_cast %36 : i32 to index
    %38 = memref.load %arg1[%37] : memref<16xi32, #tpu.memory_space<smem>>
    %c5_i32_20 = arith.constant 5 : i32
    %c0_i32_21 = arith.constant 0 : i32
    %39 = tpu.memref_slice %arg2[%38, %c0_i32_21] : memref<16x32xf32, #tpu.memory_space<any>> -> memref<1x32xf32, #tpu.memory_space<any>>
    %c5_i32_22 = arith.constant 5 : i32
    %c0_i32_23 = arith.constant 0 : i32
    %40 = tpu.memref_slice %arg4[%c5_i32_22, %c0_i32_23] : memref<8x32xf32, #tpu.memory_space<vmem>> -> memref<1x32xf32, #tpu.memory_space<vmem>>
    %41 = tpu.memref_slice %arg5[%c5_i32_20] : memref<8x!tpu.dma_semaphore, #tpu.memory_space<semaphore_mem>> -> memref<1x!tpu.dma_semaphore, #tpu.memory_space<semaphore_mem>>
    %42 = tpu.memref_squeeze %41 : memref<1x!tpu.dma_semaphore, #tpu.memory_space<semaphore_mem>> -> memref<!tpu.dma_semaphore, #tpu.memory_space<semaphore_mem>>
    tpu.enqueue_dma source(%39 : memref<1x32xf32, #tpu.memory_space<any>>) target(%40 : memref<1x32xf32, #tpu.memory_space<vmem>>) target_semaphore(%42 : memref<!tpu.dma_semaphore, #tpu.memory_space<semaphore_mem>>)
    %c6_i32 = arith.constant 6 : i32
    %43 = arith.addi %0, %c6_i32 : i32
    %44 = arith.index_cast %43 : i32 to index
    %45 = memref.load %arg1[%44] : memref<16xi32, #tpu.memory_space<smem>>
    %c6_i32_24 = arith.constant 6 : i32
    %c0_i32_25 = arith.constant 0 : i32
    %46 = tpu.memref_slice %arg2[%45, %c0_i32_25] : memref<16x32xf32, #tpu.memory_space<any>> -> memref<1x32xf32, #tpu.memory_space<any>>
    %c6_i32_26 = arith.constant 6 : i32
    %c0_i32_27 = arith.constant 0 : i32
    %47 = tpu.memref_slice %arg4[%c6_i32_26, %c0_i32_27] : memref<8x32xf32, #tpu.memory_space<vmem>> -> memref<1x32xf32, #tpu.memory_space<vmem>>
    %48 = tpu.memref_slice %arg5[%c6_i32_24] : memref<8x!tpu.dma_semaphore, #tpu.memory_space<semaphore_mem>> -> memref<1x!tpu.dma_semaphore, #tpu.memory_space<semaphore_mem>>
    %49 = tpu.memref_squeeze %48 : memref<1x!tpu.dma_semaphore, #tpu.memory_space<semaphore_mem>> -> memref<!tpu.dma_semaphore, #tpu.memory_space<semaphore_mem>>
    tpu.enqueue_dma source(%46 : memref<1x32xf32, #tpu.memory_space<any>>) target(%47 : memref<1x32xf32, #tpu.memory_space<vmem>>) target_semaphore(%49 : memref<!tpu.dma_semaphore, #tpu.memory_space<semaphore_mem>>)
    %c7_i32 = arith.constant 7 : i32
    %50 = arith.addi %0, %c7_i32 : i32
    %51 = arith.index_cast %50 : i32 to index
    %52 = memref.load %arg1[%51] : memref<16xi32, #tpu.memory_space<smem>>
    %c7_i32_28 = arith.constant 7 : i32
    %c0_i32_29 = arith.constant 0 : i32
    %53 = tpu.memref_slice %arg2[%52, %c0_i32_29] : memref<16x32xf32, #tpu.memory_space<any>> -> memref<1x32xf32, #tpu.memory_space<any>>
    %c7_i32_30 = arith.constant 7 : i32
    %c0_i32_31 = arith.constant 0 : i32
    %54 = tpu.memref_slice %arg4[%c7_i32_30, %c0_i32_31] : memref<8x32xf32, #tpu.memory_space<vmem>> -> memref<1x32xf32, #tpu.memory_space<vmem>>
    %55 = tpu.memref_slice %arg5[%c7_i32_28] : memref<8x!tpu.dma_semaphore, #tpu.memory_space<semaphore_mem>> -> memref<1x!tpu.dma_semaphore, #tpu.memory_space<semaphore_mem>>
    %56 = tpu.memref_squeeze %55 : memref<1x!tpu.dma_semaphore, #tpu.memory_space<semaphore_mem>> -> memref<!tpu.dma_semaphore, #tpu.memory_space<semaphore_mem>>
    tpu.enqueue_dma source(%53 : memref<1x32xf32, #tpu.memory_space<any>>) target(%54 : memref<1x32xf32, #tpu.memory_space<vmem>>) target_semaphore(%56 : memref<!tpu.dma_semaphore, #tpu.memory_space<semaphore_mem>>)
    %c0_i32_32 = arith.constant 0 : i32
    %c8_i32_33 = arith.constant 8 : i32
    %57 = arith.addi %c0_i32_32, %c8_i32_33 : i32
    %c1_i32_34 = arith.constant 1 : i32
    scf.for %arg6 = %c0_i32_32 to %57 step %c1_i32_34  : i32 {
      %c1_i32_36 = arith.constant 1 : i32
      %58 = arith.muli %arg6, %c1_i32_36 : i32
      %c0_i32_37 = arith.constant 0 : i32
      %59 = arith.addi %c0_i32_37, %58 : i32
      %c8_i32_38 = arith.constant 8 : i32
      %c0_i32_39 = arith.constant 0 : i32
      %60 = arith.cmpi eq, %c8_i32_38, %c0_i32_39 : i32
      %c1_i32_40 = arith.constant 1 : i32
      %61 = arith.select %60, %c1_i32_40, %c8_i32_38 : i32
      %62 = arith.remsi %59, %61 : i32
      %c0_i32_41 = arith.constant 0 : i32
      %63 = arith.cmpi ne, %62, %c0_i32_41 : i32
      %c0_i32_42 = arith.constant 0 : i32
      %64 = arith.cmpi slt, %62, %c0_i32_42 : i32
      %c0_i32_43 = arith.constant 0 : i32
      %65 = arith.cmpi slt, %61, %c0_i32_43 : i32
      %66 = arith.xori %64, %65 : i1
      %67 = arith.andi %66, %63 : i1
      %68 = arith.addi %62, %61 : i32
      %69 = arith.select %67, %68, %62 : i32
      %c0_i32_44 = arith.constant 0 : i32
      %c0_i32_45 = arith.constant 0 : i32
      %70 = tpu.memref_slice %arg2[%c0_i32_44, %c0_i32_45] : memref<16x32xf32, #tpu.memory_space<any>> -> memref<1x32xf32, #tpu.memory_space<any>>
      %c0_i32_46 = arith.constant 0 : i32
      %71 = tpu.memref_slice %arg4[%69, %c0_i32_46] : memref<8x32xf32, #tpu.memory_space<vmem>> -> memref<1x32xf32, #tpu.memory_space<vmem>>
      %72 = tpu.memref_slice %arg5[%69] : memref<8x!tpu.dma_semaphore, #tpu.memory_space<semaphore_mem>> -> memref<1x!tpu.dma_semaphore, #tpu.memory_space<semaphore_mem>>
      %73 = tpu.memref_squeeze %72 : memref<1x!tpu.dma_semaphore, #tpu.memory_space<semaphore_mem>> -> memref<!tpu.dma_semaphore, #tpu.memory_space<semaphore_mem>>
      tpu.wait_dma2 semaphore(%73 : memref<!tpu.dma_semaphore, #tpu.memory_space<semaphore_mem>>) src(%70 : memref<1x32xf32, #tpu.memory_space<any>>) dst(%71 : memref<1x32xf32, #tpu.memory_space<vmem>>)
      %74 = arith.index_cast %69 : i32 to index
      %c0 = arith.constant 0 : index
      %75 = vector.load %arg4[%74, %c0] : memref<8x32xf32, #tpu.memory_space<vmem>>, vector<1x32xf32>
      %cst = arith.constant 5.65685415 : f32
      %76 = vector.broadcast %cst : f32 to vector<1x32xf32>
      %77 = arith.mulf %75, %76 : vector<1x32xf32>
      %78 = arith.index_cast %59 : i32 to index
      %c0_47 = arith.constant 0 : index
      %79 = vector.load %arg3[%78, %c0_47] : memref<8x32xf32, #tpu.memory_space<vmem>>, vector<1x32xf32>
      tpu.vector_store %arg3[%78, %c0_47], %77 {strides = array<i32>} : memref<8x32xf32, #tpu.memory_space<vmem>>, vector<1x32xf32>,
      %c8_i32_48 = arith.constant 8 : i32
      %80 = arith.addi %59, %c8_i32_48 : i32
      %c8_i32_49 = arith.constant 8 : i32
      %81 = arith.cmpi slt, %80, %c8_i32_49 : i32
      %82 = arith.extui %81 : i1 to i32
      %c0_i32_50 = arith.constant 0 : i32
      %83 = arith.cmpi ne, %82, %c0_i32_50 : i32
      scf.if %83 {
        %c8_i32_51 = arith.constant 8 : i32
        %84 = arith.addi %59, %c8_i32_51 : i32
        %85 = arith.addi %0, %84 : i32
        %86 = arith.index_cast %85 : i32 to index
        %87 = memref.load %arg1[%86] : memref<16xi32, #tpu.memory_space<smem>>
        %c0_i32_52 = arith.constant 0 : i32
        %88 = tpu.memref_slice %arg2[%87, %c0_i32_52] : memref<16x32xf32, #tpu.memory_space<any>> -> memref<1x32xf32, #tpu.memory_space<any>>
        %c0_i32_53 = arith.constant 0 : i32
        %89 = tpu.memref_slice %arg4[%69, %c0_i32_53] : memref<8x32xf32, #tpu.memory_space<vmem>> -> memref<1x32xf32, #tpu.memory_space<vmem>>
        %90 = tpu.memref_slice %arg5[%69] : memref<8x!tpu.dma_semaphore, #tpu.memory_space<semaphore_mem>> -> memref<1x!tpu.dma_semaphore, #tpu.memory_space<semaphore_mem>>
        %91 = tpu.memref_squeeze %90 : memref<1x!tpu.dma_semaphore, #tpu.memory_space<semaphore_mem>> -> memref<!tpu.dma_semaphore, #tpu.memory_space<semaphore_mem>>
        tpu.enqueue_dma source(%88 : memref<1x32xf32, #tpu.memory_space<any>>) target(%89 : memref<1x32xf32, #tpu.memory_space<vmem>>) target_semaphore(%91 : memref<!tpu.dma_semaphore, #tpu.memory_space<semaphore_mem>>)
      } else {
      }
    }
    %c8_i32_35 = arith.constant 8 : i32
    return
  }
  func.func @transform_1(%arg0: i32, %arg1: memref<16xi32, #tpu.memory_space<smem>>) -> (i32, i32) {
    %c0_i32 = arith.constant 0 : i32
    %c0_i32_0 = arith.constant 0 : i32
    return %arg0, %c0_i32 : i32, i32
  }
}

</mosaic_0001>

<bundles_post_ra>
// kernel: tpu_custom_call.1
= control target key start
LH: loop header
LB: loop body
LE: loop exit
PB: predicated region body
PF: predicated region fallthrough
CT: control target
= control target key end

     0   :  { %s1045_s0 = inlined_call_operand.hbm [shape: s32[16], index: 0, kind: input, shape index: {}]   ;;  %s1046_s1 = inlined_call_operand.hbm [shape: f32[16,32], index: 1, kind: input, shape index: {}]   ;;  %s1047_s2 = inlined_call_operand.hbm [shape: f32[16,32], index: 2, kind: output, shape index: {}]  }
   0x1   :  { %s455_s11 = scalar_lea.hbm %s1045_s0, 16 }
   0x2   :  { %p456_p0 = scmp.ne.s32.totalorder %s1045_s0, %s455_s11  ;;  %p459_p1 = scmp.lt.u32.totalorder %s455_s11, %s1045_s0 }
   0x4   :  { %p461_p2 = pnand %p459_p1, %p456_p0 }
   0x6   :  { %464 = shalt.err (!%p461_p2)  }
   0x7   :  { %s753_s16 = smov [#allocation5]  }
   0x8   :  { %8 = dma.hbm_to_smem %s1045_s0, 16, %s753_s16, [#allocation4] }
   0x9   :  { %729 = dma.done.wait [#allocation4], 16 }
   0xa   :  { %730 = vsyncadd [#allocation4], 4294967280 }
   0xb   :  { %10 = sfence }
   0xc   :  { %11 = vsyncpa [#allocation7], 0 }
   0xd   :  { %13 = vsyncpa [#allocation7 + $0x1], 0  ;;  %s790_s19 = smov 0   ;;  %s792_s20 = smov 0  }
   0xe   :  { %s794_s21 = smov 0  }
   0xf LB: > { %s372_s0 = sadd.s32 4294967295, %s747_s21   ;;  %s807_s22 = sadd.s32 1, %s747_s21   ;;  %s747_s21 = sphi %s794_s21, %s1056_s21   ;;  %s743_s20 = sphi %s792_s20, %s1055_s20   ;;  %s739_s19 = sphi %s790_s19, %s1054_s19  }
  0x10   : > { %s22_s23 = ssub.s32 %s747_s21, %s807_s22  ;;  %s25_s24 = sadd.s32 1, %s743_s20 }
  0x11   : > { %p23_p3 = scmp.eq.s32.totalorder %s22_s23, 0  ;;  %p373_p4 = scmp.ne.s32.totalorder %s22_s23, 0 }
  0x12   : > { %p29_p5 = scmp.eq.s32.totalorder %s747_s21, 1  ;;  %p34_p6 = scmp.ne.s32.totalorder %s743_s20, %s739_s19 }
  0x13   : > { %s816_s25 = scalar_select %p23_p3, %s743_s20, %s25_s24  }
  0x14   : > { %p818_p7 = por %p373_p4, %p29_p5  ;;  %p35_p8 = scmp.eq.s32.totalorder %s372_s0, 1 }
  0x15   : > { %p374_p10 = scmp.ge.s32.totalorder %s747_s21, 2 }
  0x16   : > { %s1049_s26 = scalar_select %p818_p7, 1, 0 }
  0x17   : > { %p822_p9 = por %p35_p8, %p34_p6  ;;  %44 = sbr.rel (%p374_p10) target bundleno = 279 (0x117), region = 12 }
  0x18   : > { %s49_s28 = sand.u32 (!%p374_p10), 1, %s743_s20   ;;  %s829_s29 = sshll.u32 (!%p374_p10), %s747_s21, 3 }
  0x19   : > { %s1050_s27 = scalar_select %p822_p9, 1, 0 }
  0x1a   : > { %s833_s30 = sshll.u32 (!%p374_p10), %s49_s28, 3  ;;  %s53_s3 = sld [smem:[#allocation5 + %s829_s29]] (!%p374_p10) }
  0x1b   : > { %s754_s4 = smov (!%p374_p10), [#allocation2]   ;;  %s67_s6 = sadd.s32 (!%p374_p10), 1, %s829_s29 }
  0x1c   : > { %s63_s5 = sshll.u32 (!%p374_p10), %s754_s4, 4  ;;  %s839_s7 = sld [smem:[#allocation5 + %s67_s6]] (!%p374_p10)  ;;  %s837_s5 = int_to_ptr.vmem [resolvable:$true] %s63_s5 }
  0x1d   : > { %s84_s8 = sadd.s32 (!%p374_p10), 2, %s829_s29  ;;  %s755_s9 = smov (!%p374_p10), [#allocation2 + $0x1]  }
  0x1e   : > { %s80_s10 = sshll.u32 %s755_s9, 4  ;;  %s842_s11 = sld [smem:[#allocation5 + %s84_s8]]  ;;  %s844_s10 = int_to_ptr.vmem [resolvable:$true] %s80_s10 }
  0x1f   : > { %s852_s0 = scalar_lea.hbm %s1046_s1, 256 }
  0x20   : > { %s377_s12 = sshll.u32 %s53_s3, 4 }
  0x21   : > { %s55_s15 = scalar_lea.hbm %s1046_s1, %s377_s12 }
  0x22   : > { %s465_s16 = scalar_lea.hbm %s55_s15, 16  ;;  %p468_p12 = scmp.lt.u32.totalorder %s55_s15, %s1046_s1 }
  0x23   : > { %p466_p11 = scmp.ne.s32.totalorder %s55_s15, %s465_s16  ;;  %p469_p13 = scmp.lt.u32.totalorder %s852_s0, %s465_s16 }
  0x24   : > { %p471_p1 = scmp.lt.u32.totalorder %s465_s16, %s55_s15 }
  0x25   : > { %p470_p0 = por %p469_p13, %p468_p12 }
  0x27   : > { %p472_p2 = por %p471_p1, %p470_p0 }
  0x29   : > { %p473_p3 = pnand %p472_p2, %p466_p11 }
  0x2b   : > { %476 = shalt.err (!%p473_p3)  }
  0x2c   : > { %s477_s3 = scalar_lea.vmem %s837_s5, 16  ;;  %s861_s4 = scalar_lea.vmem %s837_s5, 128 }
  0x2d   : > { %p478_p4 = scmp.ne.s32.totalorder %s837_s5, %s477_s3  ;;  %p482_p5 = scmp.lt.s32.totalorder %s837_s5, %s837_s5 }
  0x2e   : > { %p483_p6 = scmp.lt.s32.totalorder %s861_s4, %s477_s3 }
  0x30   : > { %p484_p8 = por %p483_p6, %p482_p5 }
  0x32   : > { %p485_p10 = pnand %p484_p8, %p478_p4 }
  0x34   : > { %488 = shalt.err (!%p485_p10)  }
  0x35   : > { %66 = dma.hbm_to_vmem [thread:$0]  %s55_s15, 16, %s837_s5, [#allocation3] }
  0x36   : > { %s378_s6 = sshll.u32 %s839_s7, 4  ;;  %s756_s8 = smov [#allocation2 + $0x2]  }
  0x37   : > { %s97_s9 = sshll.u32 %s756_s8, 4  ;;  %s70_s14 = scalar_lea.hbm %s1046_s1, %s378_s6  ;;  %s871_s9 = int_to_ptr.vmem [resolvable:$true] %s97_s9 }
  0x38   : > { %s489_s16 = scalar_lea.hbm %s70_s14, 16  ;;  %p492_p12 = scmp.lt.u32.totalorder %s70_s14, %s1046_s1 }
  0x39   : > { %p490_p11 = scmp.ne.s32.totalorder %s70_s14, %s489_s16  ;;  %p493_p13 = scmp.lt.u32.totalorder %s852_s0, %s489_s16 }
  0x3a   : > { %p495_p1 = scmp.lt.u32.totalorder %s489_s16, %s70_s14 }
  0x3b   : > { %p494_p0 = por %p493_p13, %p492_p12 }
  0x3d   : > { %p496_p2 = por %p495_p1, %p494_p0 }
  0x3f   : > { %p497_p3 = pnand %p496_p2, %p490_p11 }
  0x41   : > { %500 = shalt.err (!%p497_p3)  }
  0x42   : > { %s501_s7 = scalar_lea.vmem %s844_s10, 16  ;;  %p506_p5 = scmp.lt.s32.totalorder %s844_s10, %s837_s5 }
  0x43   : > { %p502_p4 = scmp.ne.s32.totalorder %s844_s10, %s501_s7  ;;  %p507_p6 = scmp.lt.s32.totalorder %s861_s4, %s501_s7 }
  0x45   : > { %p508_p8 = por %p507_p6, %p506_p5 }
  0x47   : > { %p509_p10 = pnand %p508_p8, %p502_p4 }
  0x49   : > { %512 = shalt.err (!%p509_p10)  }
  0x4a   : > { %83 = dma.hbm_to_vmem [thread:$0]  %s70_s14, 16, %s844_s10, [#allocation3 + $0x1] }
  0x4b   : > { %s379_s15 = sshll.u32 %s842_s11, 4  ;;  %s101_s23 = sadd.s32 3, %s829_s29 }
  0x4c   : > { %s87_s6 = scalar_lea.hbm %s1046_s1, %s379_s15  ;;  %s888_s8 = sld [smem:[#allocation5 + %s101_s23]] }
  0x4d   : > { %s513_s12 = scalar_lea.hbm %s87_s6, 16  ;;  %p516_p12 = scmp.lt.u32.totalorder %s87_s6, %s1046_s1 }
  0x4e   : > { %p514_p11 = scmp.ne.s32.totalorder %s87_s6, %s513_s12  ;;  %p517_p13 = scmp.lt.u32.totalorder %s852_s0, %s513_s12 }
  0x4f   : > { %p519_p1 = scmp.lt.u32.totalorder %s513_s12, %s87_s6 }
  0x50   : > { %p518_p0 = por %p517_p13, %p516_p12 }
  0x52   : > { %p520_p2 = por %p519_p1, %p518_p0 }
  0x54   : > { %p521_p3 = pnand %p520_p2, %p514_p11 }
  0x56   : > { %524 = shalt.err (!%p521_p3)  }
  0x57   : > { %s525_s10 = scalar_lea.vmem %s871_s9, 16  ;;  %p530_p5 = scmp.lt.s32.totalorder %s871_s9, %s837_s5 }
  0x58   : > { %p526_p4 = scmp.ne.s32.totalorder %s871_s9, %s525_s10  ;;  %p531_p6 = scmp.lt.s32.totalorder %s861_s4, %s525_s10 }
  0x5a   : > { %p532_p8 = por %p531_p6, %p530_p5 }
  0x5c   : > { %p533_p10 = pnand %p532_p8, %p526_p4 }
  0x5e   : > { %536 = shalt.err (!%p533_p10)  }
  0x5f   : > { %100 = dma.hbm_to_vmem [thread:$0]  %s87_s6, 16, %s871_s9, [#allocation3 + $0x2] }
  0x60   : > { %s118_s11 = sadd.s32 4, %s829_s29  ;;  %s757_s14 = smov [#allocation2 + $0x3]  }
  0x61   : > { %s114_s17 = sshll.u32 %s757_s14, 4  ;;  %s119_s18 = sld [smem:[#allocation5 + %s118_s11]]  ;;  %s115_s17 = int_to_ptr.vmem [resolvable:$true] %s114_s17 }
  0x62   : > { %s758_s7 = smov [#allocation2 + $0x4]   ;;  %s135_s23 = sadd.s32 5, %s829_s29 }
  0x63   : > { %s131_s15 = sshll.u32 %s758_s7, 4  ;;  %s380_s24 = sshll.u32 %s888_s8, 4  ;;  %s903_s15 = int_to_ptr.vmem [resolvable:$true] %s131_s15 }
  0x64   : > { %s104_s13 = scalar_lea.hbm %s1046_s1, %s380_s24  ;;  %s908_s16 = sld [smem:[#allocation5 + %s135_s23]] }
  0x65   : > { %s537_s10 = scalar_lea.hbm %s104_s13, 16  ;;  %p540_p12 = scmp.lt.u32.totalorder %s104_s13, %s1046_s1 }
  0x66   : > { %p538_p11 = scmp.ne.s32.totalorder %s104_s13, %s537_s10  ;;  %p541_p13 = scmp.lt.u32.totalorder %s852_s0, %s537_s10 }
  0x67   : > { %p543_p1 = scmp.lt.u32.totalorder %s537_s10, %s104_s13 }
  0x68   : > { %p542_p0 = por %p541_p13, %p540_p12 }
  0x6a   : > { %p544_p2 = por %p543_p1, %p542_p0 }
  0x6c   : > { %p545_p3 = pnand %p544_p2, %p538_p11 }
  0x6e   : > { %548 = shalt.err (!%p545_p3)  }
  0x6f   : > { %s549_s8 = scalar_lea.vmem %s115_s17, 16  ;;  %p554_p5 = scmp.lt.s32.totalorder %s115_s17, %s837_s5 }
  0x70   : > { %p550_p4 = scmp.ne.s32.totalorder %s115_s17, %s549_s8  ;;  %p555_p6 = scmp.lt.s32.totalorder %s861_s4, %s549_s8 }
  0x72   : > { %p556_p8 = por %p555_p6, %p554_p5 }
  0x74   : > { %p557_p10 = pnand %p556_p8, %p550_p4 }
  0x76   : > { %560 = shalt.err (!%p557_p10)  }
  0x77   : > { %117 = dma.hbm_to_vmem [thread:$0]  %s104_s13, 16, %s115_s17, [#allocation3 + $0x3] }
  0x78   : > { %s381_s11 = sshll.u32 %s119_s18, 4  ;;  %s759_s24 = smov [#allocation2 + $0x5]  }
  0x79   : > { %s121_s23 = scalar_lea.hbm %s1046_s1, %s381_s11  ;;  %s148_s3 = sshll.u32 %s759_s24, 4  ;;  %s149_s3 = int_to_ptr.vmem [resolvable:$true] %s148_s3 }
  0x7a   : > { %s561_s12 = scalar_lea.hbm %s121_s23, 16  ;;  %p564_p12 = scmp.lt.u32.totalorder %s121_s23, %s1046_s1 }
  0x7b   : > { %p562_p11 = scmp.ne.s32.totalorder %s121_s23, %s561_s12  ;;  %p565_p13 = scmp.lt.u32.totalorder %s852_s0, %s561_s12 }
  0x7c   : > { %p567_p1 = scmp.lt.u32.totalorder %s561_s12, %s121_s23 }
  0x7d   : > { %p566_p0 = por %p565_p13, %p564_p12 }
  0x7f   : > { %p568_p2 = por %p567_p1, %p566_p0 }
  0x81   : > { %p569_p3 = pnand %p568_p2, %p562_p11 }
  0x83   : > { %572 = shalt.err (!%p569_p3)  }
  0x84   : > { %s573_s17 = scalar_lea.vmem %s903_s15, 16  ;;  %p578_p5 = scmp.lt.s32.totalorder %s903_s15, %s837_s5 }
  0x85   : > { %p574_p4 = scmp.ne.s32.totalorder %s903_s15, %s573_s17  ;;  %p579_p6 = scmp.lt.s32.totalorder %s861_s4, %s573_s17 }
  0x87   : > { %p580_p8 = por %p579_p6, %p578_p5 }
  0x89   : > { %p581_p10 = pnand %p580_p8, %p574_p4 }
  0x8b   : > { %584 = shalt.err (!%p581_p10)  }
  0x8c   : > { %134 = dma.hbm_to_vmem [thread:$0]  %s121_s23, 16, %s903_s15, [#allocation3 + $0x4] }
  0x8d   : > { %s152_s18 = sadd.s32 6, %s829_s29  ;;  %s382_s13 = sshll.u32 %s908_s16, 4 }
  0x8e   : > { %s153_s6 = sld [smem:[#allocation5 + %s152_s18]]  ;;  %s138_s14 = scalar_lea.hbm %s1046_s1, %s382_s13 }
  0x8f   : > { %s585_s7 = scalar_lea.hbm %s138_s14, 16  ;;  %p588_p12 = scmp.lt.u32.totalorder %s138_s14, %s1046_s1 }
  0x90   : > { %p586_p11 = scmp.ne.s32.totalorder %s138_s14, %s585_s7  ;;  %p589_p13 = scmp.lt.u32.totalorder %s852_s0, %s585_s7 }
  0x91   : > { %p591_p1 = scmp.lt.u32.totalorder %s585_s7, %s138_s14 }
  0x92   : > { %p590_p0 = por %p589_p13, %p588_p12 }
  0x94   : > { %p592_p2 = por %p591_p1, %p590_p0 }
  0x96   : > { %p593_p3 = pnand %p592_p2, %p586_p11 }
  0x98   : > { %596 = shalt.err (!%p593_p3)  }
  0x99   : > { %s597_s15 = scalar_lea.vmem %s149_s3, 16  ;;  %p602_p5 = scmp.lt.s32.totalorder %s149_s3, %s837_s5 }
  0x9a   : > { %p598_p4 = scmp.ne.s32.totalorder %s149_s3, %s597_s15  ;;  %p603_p6 = scmp.lt.s32.totalorder %s861_s4, %s597_s15 }
  0x9c   : > { %p604_p8 = por %p603_p6, %p602_p5 }
  0x9e   : > { %p605_p10 = pnand %p604_p8, %p598_p4 }
  0xa0   : > { %608 = shalt.err (!%p605_p10)  }
  0xa1   : > { %151 = dma.hbm_to_vmem [thread:$0]  %s138_s14, 16, %s149_s3, [#allocation3 + $0x5] }
  0xa2   : > { %s760_s16 = smov [#allocation2 + $0x6]   ;;  %s169_s10 = sadd.s32 7, %s829_s29 }
  0xa3   : > { %s165_s23 = sshll.u32 %s760_s16, 4  ;;  %s170_s9 = sld [smem:[#allocation5 + %s169_s10]]  ;;  %s166_s23 = int_to_ptr.vmem [resolvable:$true] %s165_s23 }
  0xa4   : > { %s383_s17 = sshll.u32 %s153_s6, 4  ;;  %s761_s18 = smov [#allocation2 + $0x7]  }
  0xa5   : > { %s182_s13 = sshll.u32 %s761_s18, 4  ;;  %s155_s7 = scalar_lea.hbm %s1046_s1, %s383_s17  ;;  %s183_s13 = int_to_ptr.vmem [resolvable:$true] %s182_s13 }
  0xa6   : > { %s609_s24 = scalar_lea.hbm %s155_s7, 16  ;;  %p612_p12 = scmp.lt.u32.totalorder %s155_s7, %s1046_s1 }
  0xa7   : > { %p610_p11 = scmp.ne.s32.totalorder %s155_s7, %s609_s24  ;;  %p613_p13 = scmp.lt.u32.totalorder %s852_s0, %s609_s24 }
  0xa8   : > { %p615_p1 = scmp.lt.u32.totalorder %s609_s24, %s155_s7 }
  0xa9   : > { %p614_p0 = por %p613_p13, %p612_p12 }
  0xab   : > { %p616_p2 = por %p615_p1, %p614_p0 }
  0xad   : > { %p617_p3 = pnand %p616_p2, %p610_p11 }
  0xaf   : > { %620 = shalt.err (!%p617_p3)  }
  0xb0   : > { %s621_s3 = scalar_lea.vmem %s166_s23, 16  ;;  %p626_p5 = scmp.lt.s32.totalorder %s166_s23, %s837_s5 }
  0xb1   : > { %p622_p4 = scmp.ne.s32.totalorder %s166_s23, %s621_s3  ;;  %p627_p6 = scmp.lt.s32.totalorder %s861_s4, %s621_s3 }
  0xb3   : > { %p628_p8 = por %p627_p6, %p626_p5 }
  0xb5   : > { %p629_p10 = pnand %p628_p8, %p622_p4 }
  0xb7   : > { %632 = shalt.err (!%p629_p10)  }
  0xb8   : > { %168 = dma.hbm_to_vmem [thread:$0]  %s155_s7, 16, %s166_s23, [#allocation3 + $0x6] }
  0xb9   : > { %s384_s6 = sshll.u32 %s170_s9, 4 }
  0xba   : > { %s172_s10 = scalar_lea.hbm %s1046_s1, %s384_s6 }
  0xbb   : > { %s633_s17 = scalar_lea.hbm %s172_s10, 16  ;;  %p636_p12 = scmp.lt.u32.totalorder %s172_s10, %s1046_s1 }
  0xbc   : > { %p634_p11 = scmp.ne.s32.totalorder %s172_s10, %s633_s17  ;;  %p637_p13 = scmp.lt.u32.totalorder %s852_s0, %s633_s17 }
  0xbd   : > { %p639_p1 = scmp.lt.u32.totalorder %s633_s17, %s172_s10 }
  0xbe   : > { %p638_p0 = por %p637_p13, %p636_p12 }
  0xc0   : > { %p640_p2 = por %p639_p1, %p638_p0 }
  0xc2   : > { %p641_p3 = pnand %p640_p2, %p634_p11 }
  0xc4   : > { %644 = shalt.err (!%p641_p3)  }
  0xc5   : > { %s645_s23 = scalar_lea.vmem %s183_s13, 16  ;;  %p650_p5 = scmp.lt.s32.totalorder %s183_s13, %s837_s5 }
  0xc6   : > { %p646_p4 = scmp.ne.s32.totalorder %s183_s13, %s645_s23  ;;  %p651_p6 = scmp.lt.s32.totalorder %s861_s4, %s645_s23 }
  0xc8   : > { %p652_p8 = por %p651_p6, %p650_p5 }
  0xca   : > { %p653_p10 = pnand %p652_p8, %p646_p4 }
  0xcc   : > { %656 = shalt.err (!%p653_p10)  }
  0xcd   : > { %185 = dma.hbm_to_vmem [thread:$0]  %s172_s10, 16, %s183_s13, [#allocation3 + $0x7] }
  0xce   : > { %s51_s9 = scalar_lea.vmem [#allocation6], %s833_s30  ;;  %s960_s11 = smov 0  }
  0xcf LB: >> { %p192_p11 = scmp.lt.s32.totalorder %s751_s11, 0  ;;  %s193_s7 = ssub.s32 0, %s751_s11  ;;  %s751_s11 = sphi %s960_s11, %s191_s11  }
  0xd0   : >> { %s385_s24 = smin.u32 %s751_s11, %s193_s7 }
  0xd1   : >> { %s195_s12 = sand.u32 7, %s385_s24  }
  0xd2   : >> { %s196_s15 = ssub.s32 0, %s195_s12 }
  0xd3   : >> { %s1058_s15 = smov (!%p192_p11, %s196_s15), %s195_s12 }
  0xd4   : >> { %p387_p12 = scmp.lt.s32.totalorder %s1058_s15, 0  ;;  %s202_s13 = sadd.s32 8, %s1058_s15 }
  0xd6   : >> { %s1060_s13 = smov (!%p387_p12, %s202_s13), %s1058_s15 }
  0xd7   : >> { %s204_s3 = scalar_lea.vmem [#allocation2], %s1060_s13  ;;  %s968_s6 = scalar_lea.sflag [#allocation3], %s1060_s13 }
  0xd8   : >> { %731 = dma.done.wait %s968_s6, 16 }
  0xd9   : >> { %732 = vsyncadd %s968_s6, 4294967280  ;;  %s214_s14 = sadd.s32 8, %s751_s11  ;;  %v209_v0 = vld [vmem:[%s204_s3] sm:$0x1]  ;;  %s211_s8 = scalar_lea.vmem %s51_s9, %s751_s11 [#allocation6]  ;;  %vm212_vm0 = vcmask 253952  }
  0xda   : >> { %p973_p13 = scmp.lt.s32.totalorder %s214_s14, 8  ;;  %s219_s10 = sadd.s32 %s829_s29, %s214_s14  ;;  %v210_v1 = vmul.f32 5.656854, %v209_v0 }
  0xdb   : >> { %s230_s23 = sshll.u32 %s204_s3, 4  ;;  %s231_s23 = int_to_ptr.vmem [resolvable:$true] %s230_s23 }
  0xdc   : >> { %s403_s17 = scalar_select %p973_p13, [#allocation5], [#allocation28]  ;;  %213 = vst.msk [vmem:[%s211_s8] sm:$0x1] %vm212_vm0, %v210_v1 }
  0xdd   : >> { %s1062_s10 = smov (!%p973_p13, %s219_s10), 0 }
  0xde   : >> { %s220_s18 = sld [smem:[%s403_s17 + %s1062_s10]] }
  0xe4   : >> { %s389_s7 = sshll.u32 %s220_s18, 4 }
  0xe5   : >> { %s222_s15 = scalar_lea.hbm %s1046_s1, %s389_s7 }
  0xe6   : >> { %s657_s13 = scalar_lea.hbm %s222_s15, 16  ;;  %p662_p3 = scmp.lt.u32.totalorder %s222_s15, %s1046_s1 }
  0xe7   : >> { %p658_p0 = scmp.ne.s32.totalorder %s222_s15, %s657_s13  ;;  %p663_p4 = scmp.lt.u32.totalorder %s852_s0, %s657_s13 }
  0xe8   : >> { %p665_p6 = scmp.lt.u32.totalorder %s657_s13, %s222_s15 }
  0xe9   : >> { %p659_p1 = pnand %p658_p0, %p973_p13  ;;  %p664_p5 = por %p663_p4, %p662_p3 }
  0xeb   : >> { %p660_p2 = pneg %p659_p1  ;;  %p666_p8 = por %p665_p6, %p664_p5 }
  0xed   : >> { %p667_p10 = pnand %p666_p8, %p660_p2 }
  0xef   : >> { %670 = shalt.err (!%p667_p10)  }
  0xf0   : >> { %s671_s3 = scalar_lea.vmem %s231_s23, 16  ;;  %p678_p0 = scmp.lt.s32.totalorder %s231_s23, %s837_s5 }
  0xf1   : >> { %p672_p11 = scmp.ne.s32.totalorder %s231_s23, %s671_s3  ;;  %p679_p1 = scmp.lt.s32.totalorder %s861_s4, %s671_s3 }
  0xf3   : >> { %p673_p12 = pnand %p672_p11, %p973_p13  ;;  %p680_p7 = por %p679_p1, %p678_p0 }
  0xf5   : >> { %p674_p9 = pneg %p673_p12 }
  0xf7   : >> { %p681_p3 = pnand %p680_p7, %p674_p9 }
  0xf9   : >> { %684 = shalt.err (!%p681_p3)  }
  0xfa   : >> { %405 = dma.hbm_to_vmem [thread:$0]  (%p973_p13), %s222_s15, 16, %s231_s23, %s968_s6 }
  0xfb   : >> { %s191_s11 = sadd.s32 1, %s751_s11  }
  0xfc   : >> { %p188_p2 = scmp.ge.s32.totalorder %s191_s11, 8  }
  0xfd   : > { %s391_s17 = sshll.u32 (%p188_p2), %s747_s21, 7  ;;  %s248_s16 = sshll.u32 (%p188_p2), %s51_s9, 4  ;;  %s249_s16 = int_to_ptr.vmem [resolvable:$true] %s248_s16 }
  0xfe   : > { %190 = sbr.rel (!%p188_p2) target bundleno = 207 (0xcf), region = 124  ;;  %s1008_s7 = scalar_lea.hbm (%p188_p2), %s1047_s2, %s391_s17 }
  0xff   : > { %s235_s6 = scalar_lea.sflag (%p188_p2), [#allocation7], %s49_s28  ;;  %s685_s23 = scalar_lea.vmem (%p188_p2), %s249_s16, 128 }
 0x100   : > { %p686_p7 = scmp.ne.s32.totalorder (%p188_p2), %s249_s16, %s685_s23  ;;  %p1052_p9 = scmp.ne.s32.totalorder (%p188_p2), %s1049_s26, 0 }
 0x101   : > { %s762_s29 = smov (%p188_p2), [#allocation6]  }
 0x102   : > { %p687_p13 = pnand (%p188_p2), %p686_p7, %p1052_p9  ;;  %s689_s5 = sshll.u32 (%p188_p2), %s762_s29, 4  ;;  %s690_s5 = int_to_ptr.vmem [resolvable:$false] %s689_s5 }
 0x103   : > { %s691_s0 = scalar_lea.vmem (%p188_p2), %s690_s5, 256  ;;  %p692_p5 = scmp.lt.s32.totalorder (%p188_p2), %s249_s16, %s690_s5 }
 0x104   : > { %p688_p4 = pneg (%p188_p2), %p687_p13  ;;  %p693_p6 = scmp.lt.s32.totalorder (%p188_p2), %s691_s0, %s685_s23 }
 0x106   : > { %p694_p8 = por %p693_p6, %p692_p5 }
 0x108   : > { %p695_p10 = pnand %p694_p8, %p688_p4 }
 0x10a   : > { %698 = shalt.err (!%p695_p10)
}
 0x10b   : > { %s699_s28 = scalar_lea.hbm %s1008_s7, 128  ;;  %s703_s9 = scalar_lea.hbm %s1047_s2, 256 }
 0x10c   : > { %p700_p11 = scmp.ne.s32.totalorder %s1008_s7, %s699_s28  ;;  %p704_p1 = scmp.lt.u32.totalorder %s1008_s7, %s1047_s2 }
 0x10d   : > { %p705_p3 = scmp.lt.u32.totalorder %s703_s9, %s699_s28  ;;  %p707_p7 = scmp.lt.u32.totalorder %s699_s28, %s1008_s7 }
 0x10e   : > { %p701_p12 = pnand %p700_p11, %p1052_p9 }
 0x10f   : > { %p706_p2 = por %p705_p3, %p704_p1 }
 0x110   : > { %p702_p0 = pneg %p701_p12 }
 0x111   : > { %p708_p13 = por %p707_p7, %p706_p2 }
 0x113   : > { %p709_p4 = pnand %p708_p13, %p702_p0 }
 0x115   : > { %712 = shalt.err (!%p709_p4)
}
 0x116   : > { %406 = dma.vmem_to_hbm [thread:$0]  (%p1052_p9), %s249_s16, 128, %s1008_s7, %s235_s6  }
 0x117 PF: > { %p413_p5 = scmp.ge.s32.totalorder %s747_s21, 1  ;;  %s260_s12 = sand.u32 1, %s739_s19  }
 0x118   : > { %p1053_p6 = scmp.ne.s32.totalorder %s1050_s27, 0  ;;  %s261_s15 = scalar_lea.sflag [#allocation7], %s260_s12 }
 0x11a   : > { %p409_p8 = pnand %p413_p5, %p1053_p6 }
 0x11c   : > { %734 = dma.done.wait (!%p409_p8), %s261_s15, 128  }
 0x11d   : > { %736 = vsyncadd (!%p409_p8), %s261_s15, 4294967168  ;;  %p16_p10 = scmp.ge.s32.totalorder %s807_s22, 3   ;;  %s1054_s19 = smov %s743_s20 }
 0x11e   : > { %s1055_s20 = smov %s816_s25  ;;  %s1056_s21 = smov %s807_s22 }
 0x11f   :  { %18 = sbr.rel (!%p16_p10) target bundleno = 15 (0xf), region = 135 }
 0x126   :  { %266 = vsyncpa [#allocation7], 1 }
 0x127   :  { %268 = vsyncpa [#allocation7 + $0x1], 1 }
 0x128   :  { %269 = vsyncmov [#allocation3] }
 0x12b   :  { %s270_s21 = vpop.sfrf %269 }
 0x12c   :  { %p394_p9 = scmp.ne.s32.totalorder %s270_s21, 0 }
 0x12e   :  { %274 = shalt.err (%p394_p9)  }
 0x12f   :  { %276 = vsyncmov [#allocation3 + $0x1] }
 0x132   :  { %s277_s26 = vpop.sfrf %276 }
 0x133   :  { %p395_p11 = scmp.ne.s32.totalorder %s277_s26, 0 }
 0x135   :  { %281 = shalt.err (%p395_p11)  }
 0x136   :  { %283 = vsyncmov [#allocation3 + $0x2] }
 0x139   :  { %s284_s27 = vpop.sfrf %283 }
 0x13a   :  { %p396_p12 = scmp.ne.s32.totalorder %s284_s27, 0 }
 0x13c   :  { %288 = shalt.err (%p396_p12)  }
 0x13d   :  { %290 = vsyncmov [#allocation3 + $0x3] }
 0x140   :  { %s291_s13 = vpop.sfrf %290 }
 0x141   :  { %p397_p0 = scmp.ne.s32.totalorder %s291_s13, 0 }
 0x143   :  { %295 = shalt.err (%p397_p0)  }
 0x144   :  { %297 = vsyncmov [#allocation3 + $0x4] }
 0x147   :  { %s298_s22 = vpop.sfrf %297 }
 0x148   :  { %p398_p1 = scmp.ne.s32.totalorder %s298_s22, 0 }
 0x14a   :  { %302 = shalt.err (%p398_p1)  }
 0x14b   :  { %304 = vsyncmov [#allocation3 + $0x5] }
 0x14e   :  { %s305_s1 = vpop.sfrf %304 }
 0x14f   :  { %p399_p3 = scmp.ne.s32.totalorder %s305_s1, 0 }
 0x151   :  { %309 = shalt.err (%p399_p3)  }
 0x152   :  { %311 = vsyncmov [#allocation3 + $0x6] }
 0x155   :  { %s312_s2 = vpop.sfrf %311 }
 0x156   :  { %p400_p2 = scmp.ne.s32.totalorder %s312_s2, 0 }
 0x158   :  { %316 = shalt.err (%p400_p2)  }
 0x159   :  { %318 = vsyncmov [#allocation3 + $0x7] }
 0x15c   :  { %s319_s19 = vpop.sfrf %318 }
 0x15d   :  { %p401_p7 = scmp.ne.s32.totalorder %s319_s19, 0 }
 0x15f   :  { %323 = shalt.err (%p401_p7)  }

</bundles_post_ra>
